<compile_context>
chip_gen: v7x
topology: tpu7x:2x2x1
jax: 0.10.0
libtpu: 0.0.40
codegen_flags: <defaults>
</compile_context>

<pallas_src>
import functools

import jax
import jax.numpy as jnp
from jax.experimental import pallas as pl
from jax.experimental.pallas import tpu as pltpu


# ---------------------------------------------------------------------------
# VMEM budgeting / tiling helpers
# ---------------------------------------------------------------------------

def _vmem_capacity_bytes():
    """Physical per-core VMEM; falls back to v7x's 64 MiB (the smallest)."""
    try:
        info = pltpu.get_tpu_info()
        cap = int(getattr(info, "vmem_capacity_bytes", 0)) or (64 << 20)
    except Exception:
        cap = 64 << 20
    return cap


def _tile_budget_bytes(cap):
    # ~6 live f32 (C, TM) buffers per grid step: 2x input pipeline, 2x output
    # pipeline, plus the `h` and `h*w2` intermediates.  Keep them within ~1/3
    # of physical VMEM, capped at 40 MiB so v5e/v6e tiles stay sane.
    return max(min(cap // 3, 40 << 20), 8 << 20)


def _vmem_limit_bytes(c, tm, cap):
    footprint = (6 * c * tm + 2 * c * c + 32 * c) * 4
    limit = int(footprint * 1.25) + (2 << 20)
    return int(max(min(limit, int(cap * 0.9)), 16 << 20))


def _round_up(x, m):
    return ((x + m - 1) // m) * m


def _pick_hw_tile(hw_padded, c, budget_bytes, n_batch):
    """Largest lane-dense (multiple-of-128) divisor of hw_padded that fits the
    per-step VMEM budget; keeps >= 2 grid steps when N == 1 so both v7x
    TensorCores get work."""
    per_lane_bytes = 6 * c * 4
    cap = max(budget_bytes // per_lane_bytes, 128)
    cap = min(cap, hw_padded, 8192)
    if n_batch == 1 and hw_padded >= 256:
        cap = min(cap, hw_padded // 2)
    tm = max((cap // 128) * 128, 128)
    while hw_padded % tm != 0:      # terminates: hw_padded % 128 == 0
        tm -= 128
    return tm


# ---------------------------------------------------------------------------
# Kernels
# ---------------------------------------------------------------------------

def _tiled_kernel(x_ref, w1t_ref, vecs_ref, cattn_ref, out_ref, *, use_bf16):
    """One (batch, spatial-tile) step: conv1(+BN)+ReLU -> conv2 -> sigmoid,
    fused with the (precomputed) channel attention."""
    x = x_ref[0]                           # (C, TM)  channels on sublanes
    w1t = w1t_ref[...]                     # (C, C)   BN-folded conv1 weight^T
    b1 = vecs_ref[:, 0:1]                  # (C, 1)   folded conv1 bias
    w2 = vecs_ref[:, 1:2]                  # (C, 1)   conv2 (C->1) weight
    b2 = vecs_ref[0:1, 2:3]                # (1, 1)   conv2 bias
    c_attn = cattn_ref[0]                  # (C, 1)   channel attention

    if use_bf16:
        h = jnp.dot(w1t.astype(jnp.bfloat16), x.astype(jnp.bfloat16),
                    preferred_element_type=jnp.float32)
    else:
        h = jnp.dot(w1t, x, preferred_element_type=jnp.float32)
    h = jnp.maximum(h + b1, 0.0)

    # conv2 (C -> 1) as a sublane reduction (keeps the MXU free).
    s = jnp.sum(h * w2, axis=0, keepdims=True) + b2        # (1, TM)
    s_attn = jax.nn.sigmoid(s)

    out_ref[0] = (s_attn * (c_attn * x)).astype(out_ref.dtype)


def _fused_kernel(x_ref, w1t_ref, vecs_ref, wc1_ref, bc1_ref, wc2t_ref, bc2_ref,
                  out_ref, *, inv_hw, use_bf16):
    """Small-problem fast path: the whole (C, HWp) slab of one batch is
    resident; compute global mean, channel attention, spatial attention and
    the fused output in a single HBM pass."""
    x = x_ref[0]                           # (C, HWp); padded lanes are zero

    # ---- channel attention (padded lanes contribute 0 to the sum) ----
    pooled = jnp.sum(x, axis=1, keepdims=True) * inv_hw               # (C, 1)
    # c1[r] = relu(sum_j wc1[j, r] * pooled[j] + bc1[r])   -> (1, Cr)
    c1 = jnp.maximum(
        jnp.sum(wc1_ref[...] * pooled, axis=0, keepdims=True) + bc1_ref[...],
        0.0)
    # c_attn[c] = sigmoid(sum_r wc2[r, c] * c1[r] + bc2[c]) -> (C, 1)
    c_attn = jax.nn.sigmoid(
        jnp.sum(wc2t_ref[...] * c1, axis=1, keepdims=True) + bc2_ref[...])

    # ---- spatial attention ----
    w1t = w1t_ref[...]                     # (C, C)
    b1 = vecs_ref[:, 0:1]
    w2 = vecs_ref[:, 1:2]
    b2 = vecs_ref[0:1, 2:3]
    if use_bf16:
        h = jnp.dot(w1t.astype(jnp.bfloat16), x.astype(jnp.bfloat16),
                    preferred_element_type=jnp.float32)
    else:
        h = jnp.dot(w1t, x, preferred_element_type=jnp.float32)
    h = jnp.maximum(h + b1, 0.0)
    s_attn = jax.nn.sigmoid(jnp.sum(h * w2, axis=0, keepdims=True) + b2)

    out_ref[0] = (s_attn * (c_attn * x)).astype(out_ref.dtype)


# ---------------------------------------------------------------------------
# Wrapper
# ---------------------------------------------------------------------------

def da_block_pallas(x_nchw, params, *, allow_fused=True):
    """x_nchw: (N, C, H, W) float32. Returns (N, C, H, W) float32."""
    N, C, H, W = x_nchw.shape
    HW = H * W
    HWp = _round_up(HW, 128)
    Cr = params["wc1"].shape[1]

    cap = _vmem_capacity_bytes()
    budget = _tile_budget_bytes(cap)

    # NCHW -> (N, C, HW): free reshape, channels on sublanes, spatial on lanes.
    x = x_nchw.reshape(N, C, HW)

    # Fold BatchNorm into conv1.
    w1_f = params["w1"] * params["bn_scale"]                        # (Cin, Cout)
    b1_f = params["b1"] * params["bn_scale"] + params["bn_shift"]   # (1, C)
    w1t = jnp.transpose(w1_f)                                       # (Cout, Cin)
    vecs = jnp.concatenate(
        [jnp.transpose(b1_f),                                       # (C, 1)
         params["w2"],                                              # (C, 1)
         jnp.broadcast_to(params["b2"], (C, 1))], axis=1)           # (C, 3)

    use_bf16 = C >= 256   # only in the MXU-bound regime

    # Pad the spatial axis to a multiple of 128 so every store is lane-dense.
    x_p = jnp.pad(x, ((0, 0), (0, 0), (0, HWp - HW))) if HWp != HW else x

    fused_ok = allow_fused and (6 * C * HWp * 4) <= budget

    if fused_ok:
        bc1 = params["bc1"]                                         # (1, Cr)
        wc2t = jnp.transpose(params["wc2"])                         # (C, Cr)
        bc2c = jnp.transpose(params["bc2"])                         # (C, 1)
        kernel = functools.partial(_fused_kernel, inv_hw=1.0 / HW,
                                   use_bf16=use_bf16)
        out = pl.pallas_call(
            kernel,
            out_shape=jax.ShapeDtypeStruct((N, C, HWp), jnp.float32),
            grid_spec=pltpu.PrefetchScalarGridSpec(
                num_scalar_prefetch=0,
                grid=(N,),
                in_specs=[
                    pl.BlockSpec((1, C, HWp), lambda n: (n, 0, 0)),  # x slab
                    pl.BlockSpec((C, C), lambda n: (0, 0)),          # w1t
                    pl.BlockSpec((C, 3), lambda n: (0, 0)),          # [b1', w2, b2]
                    pl.BlockSpec((C, Cr), lambda n: (0, 0)),         # wc1
                    pl.BlockSpec((1, Cr), lambda n: (0, 0)),         # bc1
                    pl.BlockSpec((C, Cr), lambda n: (0, 0)),         # wc2^T
                    pl.BlockSpec((C, 1), lambda n: (0, 0)),          # bc2^T
                ],
                out_specs=pl.BlockSpec((1, C, HWp), lambda n: (n, 0, 0)),
            ),
            compiler_params=pltpu.CompilerParams(
                dimension_semantics=("parallel",),
                vmem_limit_bytes=_vmem_limit_bytes(C, HWp, cap),
            ),
        )(x_p, w1t, vecs, params["wc1"], bc1, wc2t, bc2c)
    else:
        # Channel attention hoisted to plain JAX (tiny O(N*C*Cr) work); this
        # unlocks HW tiling in the kernel (no in-kernel global mean needed).
        pooled = jnp.mean(x, axis=2)                                    # (N, C)
        c1 = jnp.maximum(pooled @ params["wc1"] + params["bc1"], 0.0)
        c_attn = jax.nn.sigmoid(c1 @ params["wc2"] + params["bc2"])     # (N, C)
        c_attn = c_attn.reshape(N, C, 1)

        TM = _pick_hw_tile(HWp, C, budget, N)
        grid = (N, HWp // TM)
        kernel = functools.partial(_tiled_kernel, use_bf16=use_bf16)
        out = pl.pallas_call(
            kernel,
            out_shape=jax.ShapeDtypeStruct((N, C, HWp), jnp.float32),
            grid_spec=pltpu.PrefetchScalarGridSpec(
                num_scalar_prefetch=0,
                grid=grid,
                in_specs=[
                    pl.BlockSpec((1, C, TM), lambda n, t: (n, 0, t)),   # x tile
                    pl.BlockSpec((C, C), lambda n, t: (0, 0)),          # w1t
                    pl.BlockSpec((C, 3), lambda n, t: (0, 0)),          # [b1', w2, b2]
                    pl.BlockSpec((1, C, 1), lambda n, t: (n, 0, 0)),    # c_attn
                ],
                out_specs=pl.BlockSpec((1, C, TM), lambda n, t: (n, 0, t)),
            ),
            compiler_params=pltpu.CompilerParams(
                dimension_semantics=("parallel", "parallel"),
                vmem_limit_bytes=_vmem_limit_bytes(C, TM, cap),
            ),
        )(x_p, w1t, vecs, c_attn)

    if HWp != HW:
        out = out[:, :, :HW]
    return out.reshape(N, C, H, W)


# ---------------------------------------------------------------------------
# Pure-JAX reference (unfolded params, original math) for validation
# ---------------------------------------------------------------------------

def da_block_ref(x_nchw, params):
    N, C, H, W = x_nchw.shape
    x = jnp.transpose(x_nchw, (0, 2, 3, 1)).reshape(N, H * W, C)

    h = x @ params["w1"] + params["b1"]
    h = h * params["bn_scale"] + params["bn_shift"]
    h = jnp.maximum(h, 0.0)
    s_attn = jax.nn.sigmoid(h @ params["w2"] + params["b2"])          # (N,HW,1)

    pooled = jnp.mean(x, axis=1, keepdims=True)                       # (N,1,C)
    c1 = jnp.maximum(pooled @ params["wc1"] + params["bc1"], 0.0)
    c_attn = jax.nn.sigmoid(c1 @ params["wc2"] + params["bc2"])       # (N,1,C)

    out = s_attn * c_attn * x
    return jnp.transpose(out.reshape(N, H, W, C), (0, 3, 1, 2))


def make_params(key, channels, reduction=16):
    """Deterministic parameter init. Weight matrices are stored as (in, out),
    i.e. already transposed relative to PyTorch Conv2d's (out, in, 1, 1)."""
    C = channels
    Cr = max(C // reduction, 1)
    ks = jax.random.split(key, 8)
    f = jnp.float32

    w1 = jax.random.normal(ks[0], (C, C), f) * 0.1
    b1 = jax.random.normal(ks[1], (1, C), f) * 0.1
    w2 = jax.random.normal(ks[2], (C, 1), f) * 0.1
    b2 = jax.random.normal(ks[3], (1, 1), f) * 0.1
    wc1 = jax.random.normal(ks[4], (C, Cr), f) * 0.1
    bc1 = jax.random.normal(ks[5], (1, Cr), f) * 0.1
    wc2 = jax.random.normal(ks[6], (Cr, C), f) * 0.1
    bc2 = jax.random.normal(ks[7], (1, C), f) * 0.1

    # BatchNorm2d params (inference form).
    gamma = jnp.ones((1, C), f)
    beta = jnp.zeros((1, C), f)
    running_mean = jnp.full((1, C), 0.05, f)
    running_var = jnp.full((1, C), 1.2, f)
    eps = 1e-5
    bn_scale = gamma / jnp.sqrt(running_var + eps)
    bn_shift = beta - running_mean * bn_scale

    return dict(w1=w1, b1=b1, w2=w2, b2=b2, wc1=wc1, bc1=bc1, wc2=wc2, bc2=bc2,
                bn_scale=bn_scale, bn_shift=bn_shift)


if __name__ == "__main__":
    reduction = 16
    key = jax.random.PRNGKey(0)

    # (16x16 -> HW already a 128-multiple) and (10x10 -> exercises lane padding)
    for (N, C, H, W) in [(2, 32, 16, 16), (2, 32, 10, 10)]:
        key, kx, kp = jax.random.split(key, 3)
        x = jax.random.normal(kx, (N, C, H, W), jnp.float32)
        params = make_params(kp, C, reduction)
        ref = da_block_ref(x, params)

        for fused in (True, False):   # check both the fused and tiled paths
            out = jax.block_until_ready(
                da_block_pallas(x, params, allow_fused=fused))
            assert out.shape == (N, C, H, W)
            err = float(jnp.max(jnp.abs(out - ref)))
            assert err < 2e-3, (
                f"mismatch vs reference (fused={fused}, shape={(N, C, H, W)}): "
                f"max abs err {err}")

    print("KERNEL_OK")
</pallas_src>

<mosaic_0001>
module attributes {stable_mosaic.version = 11 : i64} {
  func.func @_fused_kernel(%arg0: i32, %arg1: memref<1x32x256xf32, #tpu.memory_space<vmem>>, %arg2: memref<32x32xf32, #tpu.memory_space<vmem>>, %arg3: memref<32x3xf32, #tpu.memory_space<vmem>>, %arg4: memref<32x2xf32, #tpu.memory_space<vmem>>, %arg5: memref<1x2xf32, #tpu.memory_space<vmem>>, %arg6: memref<32x2xf32, #tpu.memory_space<vmem>>, %arg7: memref<32x1xf32, #tpu.memory_space<vmem>>, %arg8: memref<1x32x256xf32, #tpu.memory_space<vmem>>) attributes {dimension_semantics = [#tpu.dimension_semantics<parallel>], iteration_bounds = array<i64: 2>, scalar_prefetch = 0 : i64, scratch_operands = 0 : i64, tpu.core_type = #tpu.core_type<tc>, window_params = [{transform_indices = @transform_0, window_bounds = array<i64: 1, 32, 256>}, {pipeline_mode = #tpu.pipeline_mode<synchronous>, transform_indices = @transform_1, window_bounds = array<i64: 32, 32>}, {pipeline_mode = #tpu.pipeline_mode<synchronous>, transform_indices = @transform_2, window_bounds = array<i64: 32, 3>}, {pipeline_mode = #tpu.pipeline_mode<synchronous>, transform_indices = @transform_3, window_bounds = array<i64: 32, 2>}, {pipeline_mode = #tpu.pipeline_mode<synchronous>, transform_indices = @transform_4, window_bounds = array<i64: 1, 2>}, {pipeline_mode = #tpu.pipeline_mode<synchronous>, transform_indices = @transform_5, window_bounds = array<i64: 32, 2>}, {pipeline_mode = #tpu.pipeline_mode<synchronous>, transform_indices = @transform_6, window_bounds = array<i64: 32, 1>}, {transform_indices = @transform_7, window_bounds = array<i64: 1, 32, 256>}]} {
    %c0 = arith.constant 0 : index
    %c0_0 = arith.constant 0 : index
    %c0_1 = arith.constant 0 : index
    %0 = vector.load %arg1[%c0, %c0_0, %c0_1] : memref<1x32x256xf32, #tpu.memory_space<vmem>>, vector<1x32x256xf32>
    %1 = vector.shape_cast %0 : vector<1x32x256xf32> to vector<32x256xf32>
    %cst = arith.constant dense<0.000000e+00> : vector<32xf32>
    %2 = vector.multi_reduction <add>, %1, %cst [1] : vector<32x256xf32> to vector<32xf32>
    %3 = vector.shape_cast %2 : vector<32xf32> to vector<32x1xf32>
    %cst_2 = arith.constant 3.906250e-03 : f32
    %4 = vector.broadcast %cst_2 : f32 to vector<32x1xf32>
    %5 = arith.mulf %3, %4 : vector<32x1xf32>
    %c0_3 = arith.constant 0 : index
    %c0_4 = arith.constant 0 : index
    %6 = vector.load %arg4[%c0_3, %c0_4] : memref<32x2xf32, #tpu.memory_space<vmem>>, vector<32x2xf32>
    %7 = vector.broadcast %5 : vector<32x1xf32> to vector<32x2xf32>
    %8 = arith.mulf %6, %7 : vector<32x2xf32>
    %cst_5 = arith.constant dense<0.000000e+00> : vector<2xf32>
    %9 = vector.multi_reduction <add>, %8, %cst_5 [0] : vector<32x2xf32> to vector<2xf32>
    %10 = vector.shape_cast %9 : vector<2xf32> to vector<1x2xf32>
    %c0_6 = arith.constant 0 : index
    %c0_7 = arith.constant 0 : index
    %11 = vector.load %arg5[%c0_6, %c0_7] : memref<1x2xf32, #tpu.memory_space<vmem>>, vector<1x2xf32>
    %12 = arith.addf %10, %11 : vector<1x2xf32>
    %cst_8 = arith.constant 0.000000e+00 : f32
    %13 = vector.broadcast %cst_8 : f32 to vector<1x2xf32>
    %14 = arith.maximumf %12, %13 : vector<1x2xf32>
    %c0_9 = arith.constant 0 : index
    %c0_10 = arith.constant 0 : index
    %15 = vector.load %arg6[%c0_9, %c0_10] : memref<32x2xf32, #tpu.memory_space<vmem>>, vector<32x2xf32>
    %16 = vector.broadcast %14 : vector<1x2xf32> to vector<32x2xf32>
    %17 = arith.mulf %15, %16 : vector<32x2xf32>
    %cst_11 = arith.constant dense<0.000000e+00> : vector<32xf32>
    %18 = vector.multi_reduction <add>, %17, %cst_11 [1] : vector<32x2xf32> to vector<32xf32>
    %19 = vector.shape_cast %18 : vector<32xf32> to vector<32x1xf32>
    %c0_12 = arith.constant 0 : index
    %c0_13 = arith.constant 0 : index
    %20 = vector.load %arg7[%c0_12, %c0_13] : memref<32x1xf32, #tpu.memory_space<vmem>>, vector<32x1xf32>
    %21 = arith.addf %19, %20 : vector<32x1xf32>
    %22 = arith.negf %21 : vector<32x1xf32>
    %23 = math.exp %22 : vector<32x1xf32>
    %cst_14 = arith.constant 1.000000e+00 : f32
    %24 = vector.broadcast %cst_14 : f32 to vector<32x1xf32>
    %25 = arith.addf %24, %23 : vector<32x1xf32>
    %26 = arith.divf %24, %25 : vector<32x1xf32>
    %c0_15 = arith.constant 0 : index
    %c0_16 = arith.constant 0 : index
    %27 = vector.load %arg2[%c0_15, %c0_16] : memref<32x32xf32, #tpu.memory_space<vmem>>, vector<32x32xf32>
    %c0_17 = arith.constant 0 : index
    %c0_18 = arith.constant 0 : index
    %28 = vector.load %arg3[%c0_17, %c0_18] : memref<32x3xf32, #tpu.memory_space<vmem>>, vector<32x1xf32>
    %c0_19 = arith.constant 0 : index
    %c1 = arith.constant 1 : index
    %29 = vector.load %arg3[%c0_19, %c1] : memref<32x3xf32, #tpu.memory_space<vmem>>, vector<32x1xf32>
    %c0_20 = arith.constant 0 : index
    %c2 = arith.constant 2 : index
    %30 = vector.load %arg3[%c0_20, %c2] : memref<32x3xf32, #tpu.memory_space<vmem>>, vector<1x1xf32>
    %cst_21 = arith.constant dense<0.000000e+00> : vector<32x256xf32>
    %31 = tpu.matmul %27, %1, %cst_21 {dimension_numbers = #tpu.dot_dimension_numbers<[1], [0], [0], [1], [0, 0, 1, 1], [], []>} : vector<32x32xf32>, vector<32x256xf32>, vector<32x256xf32> -> vector<32x256xf32>
    %32 = vector.broadcast %28 : vector<32x1xf32> to vector<32x256xf32>
    %33 = arith.addf %31, %32 : vector<32x256xf32>
    %cst_22 = arith.constant 0.000000e+00 : f32
    %34 = vector.broadcast %cst_22 : f32 to vector<32x256xf32>
    %35 = arith.maximumf %33, %34 : vector<32x256xf32>
    %36 = vector.broadcast %29 : vector<32x1xf32> to vector<32x256xf32>
    %37 = arith.mulf %35, %36 : vector<32x256xf32>
    %cst_23 = arith.constant dense<0.000000e+00> : vector<256xf32>
    %38 = vector.multi_reduction <add>, %37, %cst_23 [0] : vector<32x256xf32> to vector<256xf32>
    %39 = vector.shape_cast %38 : vector<256xf32> to vector<1x256xf32>
    %40 = vector.broadcast %30 : vector<1x1xf32> to vector<1x256xf32>
    %41 = arith.addf %39, %40 : vector<1x256xf32>
    %42 = arith.negf %41 : vector<1x256xf32>
    %43 = math.exp %42 : vector<1x256xf32>
    %cst_24 = arith.constant 1.000000e+00 : f32
    %44 = vector.broadcast %cst_24 : f32 to vector<1x256xf32>
    %45 = arith.addf %44, %43 : vector<1x256xf32>
    %46 = arith.divf %44, %45 : vector<1x256xf32>
    %47 = vector.broadcast %26 : vector<32x1xf32> to vector<32x256xf32>
    %48 = arith.mulf %47, %1 : vector<32x256xf32>
    %49 = vector.broadcast %46 : vector<1x256xf32> to vector<32x256xf32>
    %50 = arith.mulf %49, %48 : vector<32x256xf32>
    %c0_25 = arith.constant 0 : index
    %c0_26 = arith.constant 0 : index
    %c0_27 = arith.constant 0 : index
    %51 = vector.load %arg8[%c0_25, %c0_26, %c0_27] : memref<1x32x256xf32, #tpu.memory_space<vmem>>, vector<1x32x256xf32>
    %52 = vector.shape_cast %51 : vector<1x32x256xf32> to vector<32x256xf32>
    %53 = vector.shape_cast %50 : vector<32x256xf32> to vector<1x32x256xf32>
    tpu.vector_store %arg8[%c0_25, %c0_26, %c0_27], %53 {strides = array<i32>} : memref<1x32x256xf32, #tpu.memory_space<vmem>>, vector<1x32x256xf32>,
    return
  }
  func.func @transform_0(%arg0: i32) -> (i32, i32, i32) {
    %c0_i32 = arith.constant 0 : i32
    %c0_i32_0 = arith.constant 0 : i32
    %c0_i32_1 = arith.constant 0 : i32
    return %arg0, %c0_i32, %c0_i32_0 : i32, i32, i32
  }
  func.func @transform_1(%arg0: i32) -> (i32, i32) {
    %c0_i32 = arith.constant 0 : i32
    %c0_i32_0 = arith.constant 0 : i32
    %c0_i32_1 = arith.constant 0 : i32
    return %c0_i32, %c0_i32_0 : i32, i32
  }
  func.func @transform_2(%arg0: i32) -> (i32, i32) {
    %c0_i32 = arith.constant 0 : i32
    %c0_i32_0 = arith.constant 0 : i32
    %c0_i32_1 = arith.constant 0 : i32
    return %c0_i32, %c0_i32_0 : i32, i32
  }
  func.func @transform_3(%arg0: i32) -> (i32, i32) {
    %c0_i32 = arith.constant 0 : i32
    %c0_i32_0 = arith.constant 0 : i32
    %c0_i32_1 = arith.constant 0 : i32
    return %c0_i32, %c0_i32_0 : i32, i32
  }
  func.func @transform_4(%arg0: i32) -> (i32, i32) {
    %c0_i32 = arith.constant 0 : i32
    %c0_i32_0 = arith.constant 0 : i32
    %c0_i32_1 = arith.constant 0 : i32
    return %c0_i32, %c0_i32_0 : i32, i32
  }
  func.func @transform_5(%arg0: i32) -> (i32, i32) {
    %c0_i32 = arith.constant 0 : i32
    %c0_i32_0 = arith.constant 0 : i32
    %c0_i32_1 = arith.constant 0 : i32
    return %c0_i32, %c0_i32_0 : i32, i32
  }
  func.func @transform_6(%arg0: i32) -> (i32, i32) {
    %c0_i32 = arith.constant 0 : i32
    %c0_i32_0 = arith.constant 0 : i32
    %c0_i32_1 = arith.constant 0 : i32
    return %c0_i32, %c0_i32_0 : i32, i32
  }
  func.func @transform_7(%arg0: i32) -> (i32, i32, i32) {
    %c0_i32 = arith.constant 0 : i32
    %c0_i32_0 = arith.constant 0 : i32
    %c0_i32_1 = arith.constant 0 : i32
    return %arg0, %c0_i32, %c0_i32_0 : i32, i32, i32
  }
}

</mosaic_0001>

<bundles_post_ra>
// kernel: tpu_custom_call.1
= control target key start
LH: loop header
LB: loop body
LE: loop exit
PB: predicated region body
PF: predicated region fallthrough
CT: control target
= control target key end

     0   :  { %12 = vsyncpa [#allocation3], 0  ;;  %s1281_s0 = inlined_call_operand.vmem [shape: f32[2,32,256], index: 0, kind: input, shape index: {}]   ;;  %s1282_s1 = inlined_call_operand.hbm [shape: f32[32,32], index: 1, kind: input, shape index: {}]   ;;  %s1283_s2 = inlined_call_operand.vmem [shape: f32[32,3], index: 2, kind: input, shape index: {}]   ;;  %s1284_s3 = inlined_call_operand.vmem [shape: f32[32,2], index: 3, kind: input, shape index: {}]   ;;  %s1285_s4 = inlined_call_operand.vmem [shape: f32[1,2], index: 4, kind: input, shape index: {}]   ;;  %s1286_s5 = inlined_call_operand.vmem [shape: f32[32,2], index: 5, kind: input, shape index: {}]   ;;  %s1287_s6 = inlined_call_operand.vmem [shape: f32[32,1], index: 6, kind: input, shape index: {}]   ;;  %s1288_s7 = inlined_call_operand.hbm [shape: f32[2,32,256], index: 7, kind: output, shape index: {}]  }
   0x1   :  { %13 = vsyncpa [#allocation4], 0 }
   0x2   :  { %15 = vsyncpa [#allocation4 + $0x1], 0  ;;  %s1008_s24 = smov 0   ;;  %s1010_s25 = smov 0  }
   0x3   :  { %s1012_s26 = smov 0   ;;  %s1014_s27 = smov 0  }
   0x4 LB: > { %s1029_s28 = sadd.s32 4294967295, %s956_s27   ;;  %s737_s29 = sadd.s32 4294967294, %s956_s27   ;;  %s956_s27 = sphi %s1014_s27, %s1304_s27   ;;  %s952_s26 = sphi %s1012_s26, %s1303_s26   ;;  %s948_s25 = sphi %s1010_s25, %s1302_s25   ;;  %s944_s24 = sphi %s1008_s24, %s1301_s24  }
   0x5   : > { %s1033_s30 = sadd.s32 1, %s956_s27   ;;  %s180_s8 = sadd.s32 1, %s952_s26 }
   0x6   : > { %s177_s9 = ssub.s32 %s956_s27, %s1033_s30  ;;  %p190_p0 = scmp.ne.s32.totalorder %s952_s26, %s948_s25 }
   0x7   : > { %p178_p1 = scmp.eq.s32.totalorder %s177_s9, 0  ;;  %p191_p2 = scmp.eq.s32.totalorder %s1029_s28, 1 }
   0x8   : > { %p196_p3 = scmp.ne.s32.totalorder %s948_s25, %s944_s24  ;;  %p197_p4 = scmp.eq.s32.totalorder %s737_s29, 1 }
   0x9   : > { %s1044_s10 = scalar_select %p178_p1, %s952_s26, %s180_s8  }
   0xa   : > { %p1046_p5 = por %p191_p2, %p190_p0  ;;  %p1050_p6 = por %p197_p4, %p196_p3 }
   0xb   : > { %p738_p7 = scmp.ge.s32.totalorder %s956_s27, 1  ;;  %p204_p8 = scmp.lt.s32.totalorder %s956_s27, 3 }
   0xc   : > { %s1292_s11 = scalar_select %p1046_p5, 1, 0 }
   0xd   : > { %s1293_s12 = scalar_select %p1050_p6, 1, 0 }
   0xe   : > { %p1289_p9 = scmp.eq.s32.totalorder %s1029_s28, 0  ;;  %p1057_p10 = pnand %p738_p7, %p204_p8 }
   0xf   : > { %s958_s14 = smov [#allocation2]   ;;  %s862_s19 = scalar_lea.hbm %s1282_s1, 512 }
  0x10   : > { %s1294_s13 = scalar_select %p1057_p10, 1, 0 }
  0x11   : > { %s216_s15 = sshll.u32 %s958_s14, 4  ;;  %p781_p11 = pneg %p1057_p10  ;;  %s217_s15 = int_to_ptr.vmem [resolvable:$true] %s216_s15 }
  0x12   : > { %p863_p13 = scmp.ne.s32.totalorder %s1282_s1, %s862_s19  ;;  %p869_p3 = scmp.lt.u32.totalorder %s862_s19, %s1282_s1 }
  0x13   : > { %p1065_p12 = pnand %p1289_p9, %p781_p11 }
  0x15   : > { %p864_p0 = pneg %p1065_p12 }
  0x17   : > { %p865_p1 = pnand %p864_p0, %p863_p13 }
  0x19   : > { %p866_p2 = pneg %p865_p1 }
  0x1b   : > { %p871_p4 = pnand %p869_p3, %p866_p2 }
  0x1d   : > { %874 = shalt.err (!%p871_p4)
}
  0x1e   : > { %s875_s29 = scalar_lea.vmem %s217_s15, 512  ;;  %p883_p9 = scmp.lt.s32.totalorder %s217_s15, %s217_s15 }
  0x1f   : > { %p876_p7 = scmp.ne.s32.totalorder %s217_s15, %s875_s29  ;;  %p884_p6 = scmp.lt.s32.totalorder %s875_s29, %s875_s29 }
  0x21   : > { %p878_p8 = pnand %p876_p7, %p864_p0  ;;  %p885_p5 = por %p884_p6, %p883_p9 }
  0x23   : > { %p879_p11 = pneg %p878_p8 }
  0x25   : > { %p886_p10 = pnand %p885_p5, %p879_p11 }
  0x27   : > { %889 = shalt.err (!%p886_p10)
}
  0x28   : > { %s959_s8 = smov 128   ;;  %s960_s9 = smov 8  }
  0x29   : > { %784 = dma.hbm_to_vmem [thread:$0]  (!%p1065_p12), %s1282_s1, 512, %s217_s15, [#allocation3], %s959_s8, %s959_s8, %s960_s9  }
  0x2a   : > { %p1296_p13 = scmp.ne.s32.totalorder %s1294_s13, 0 }
  0x2b   : > { %p1297_p1 = scmp.eq.s32.totalorder (!%p1296_p13), %s1029_s28, 0 }
  0x2c   : > { %255 = sbr.rel (%p1296_p13) target bundleno = 609 (0x261), region = 48 }
  0x33   : > { %935 = dma.done.wait (%p1297_p1), [#allocation3], 512   ;;  %p1298_p0 = pmov %p1297_p1 }
  0x34   : > { %p287_p5 = scmp.lt.s32.totalorder %s1029_s28, 1  ;;  %v961_v0 = vmov 0.0   ;;  %v397_v17 = vld [vmem:[#allocation2] sm:$0xff]  ;;  %vm426_vm0 = vcmask 261120   ;;  %v398_v18 = vld [vmem:[#allocation2 + $0x8] sm:$0xff]  ;;  %v399_v19 = vld [vmem:[#allocation2 + $0x10] sm:$0xff]  ;;  %v345_v48 = vlaneseq }
  0x35   : > { %937 = vsyncadd (%p1298_p0), [#allocation3], 4294966784  ;;  %503 = vmatprep.mubr.f32.mxu0 %v961_v0  ;;  %515 = vmatprep.mubr.f32.mxu1 %v961_v0  ;;  %v400_v20 = vld [vmem:[#allocation2 + $0x18] sm:$0xff]  ;;  %v962_v21 = vmov 0   ;;  %v316_v25 = vld [vmem:[%s1284_s3] sm:$0xff]  ;;  %vm324_vm1 = vcmask 15360  }
  0x36   : > { %s288_s16 = scalar_select %p287_p5, %s1029_s28, 1  ;;  %834 = vset.pattern.permute.xlu1 %v962_v21  ;;  %833 = vset.pattern.permute.xlu0 %v962_v21  ;;  %v318_v27 = vld [vmem:[%s1284_s3 + $0x10] sm:$0xff]  ;;  %v317_v28 = vld [vmem:[%s1284_s3 + $0x8] sm:$0xff]  ;;  %v319_v32 = vld [vmem:[%s1284_s3 + $0x18] sm:$0xff]  ;;  %v346_v51 = vshrl.u32 %v345_v48, 7 }
  0x37   : > { %v338_v52 = vld [vmem:[%s1285_s4] sm:$0x1]  ;;  %v342_v57 = vld [vmem:[%s1286_s5 + $0x8] sm:$0xff]  ;;  %v343_v60 = vld [vmem:[%s1286_s5 + $0x10] sm:$0xff]  ;;  %s284_s17 = sand.u32 1, %s948_s25   ;;  %s762_s19 = sshll.u32 %s1029_s28, 10 }
  0x38   : > { %s761_s18 = sshll.u32 %s288_s16, 6  ;;  %v1149_v55 = vsub.s32 0, %v346_v51  ;;  %v341_v58 = vld [vmem:[%s1286_s5] sm:$0xff]  ;;  %v368_v51 = vld [vmem:[%s1287_s6 + $0x18] sm:$0xff]  ;;  %s743_s16 = sshll.u32 %s284_s17, 6 }
  0x39   : > { %s291_s15 = scalar_lea.vmem %s1281_s0, %s761_s18  ;;  %s286_s18 = scalar_lea.vmem [#allocation5], %s743_s16 }
  0x3a   : > { %v1096_v1 = vld [vmem:[%s291_s15] sm:$0xff]  ;;  %v1098_v2 = vld [vmem:[%s291_s15 + $0x8] sm:$0xff]  ;;  %v1106_v6 = vld [vmem:[%s291_s15 + $0x10] sm:$0xff]  ;;  %s663_s20 = sshll.u32 %s286_s18, 4  ;;  %s1234_s21 = scalar_lea.hbm %s1288_s7, %s762_s19  ;;  %s1236_s20 = int_to_ptr.vmem [resolvable:$true] %s663_s20 }
  0x3b   : > { %v1100_v3 = vld [vmem:[%s291_s15 + $0x20] sm:$0xff]  ;;  %v300_v4 = vadd.f32 %v1098_v2, %v1096_v1  ;;  %v1104_v5 = vld [vmem:[%s291_s15 + $0x28] sm:$0xff]  ;;  %v1108_v7 = vld [vmem:[%s291_s15 + $0x18] sm:$0xff]  ;;  %v765_v12 = vpack.c.bf16 %v1106_v6, %v1096_v1  ;;  %s1240_s28 = scalar_lea.sflag [#allocation4], %s284_s17  ;;  %s890_s22 = scalar_lea.vmem %s1236_s20, 1024 }
  0x3c   : > { %v306_v8 = vadd.f32 %v1104_v5, %v1100_v3  ;;  %v1112_v9 = vld [vmem:[%s291_s15 + $0x30] sm:$0xff]  ;;  %v1114_v10 = vld [vmem:[%s291_s15 + $0x38] sm:$0xff]  ;;  %v763_v11 = vpack.c.bf16 %v1108_v7, %v1098_v2  ;;  %v303_v13 = vadd.f32 %v1108_v7, %v1106_v6  ;;  %p891_p6 = scmp.ne.s32.totalorder %s1236_s20, %s890_s22  ;;  %p1299_p9 = scmp.ne.s32.totalorder %s1292_s11, 0 }
  0x3d   : > { %301 = vadd.xlane.f32.xlu0 %v300_v4  ;;  %v767_v14 = vpack.c.bf16 %v1114_v10, %v1104_v5  ;;  %v309_v15 = vadd.f32 %v1114_v10, %v1112_v9  ;;  %v769_v16 = vpack.c.bf16 %v1112_v9, %v1100_v3  ;;  %s965_s23 = smov [#allocation5]  }
  0x3e   : > { %307 = vadd.xlane.f32.xlu1 %v306_v8  ;;  %764 = vmatprep.subr.bf16.mxu0 %v763_v11  ;;  %p892_p10 = pnand %p891_p6, %p1299_p9  ;;  %s894_s29 = sshll.u32 %s965_s23, 4  ;;  %s895_s29 = int_to_ptr.vmem [resolvable:$false] %s894_s29 }
  0x3f   : > { %766 = vmatpush1.bf16.msra.mxu0 %v765_v12  ;;  %771 = vmatprep.subr.bf16.mxu1 %v763_v11  ;;  %v402_v11 = vld [vmem:[%s1283_s2 + $0x8] sm:$0xff]  ;;  %s896_s8 = scalar_lea.vmem %s895_s29, 2048  ;;  %p897_p2 = scmp.lt.s32.totalorder %s1236_s20, %s895_s29 }
  0x40   : > { %768 = vmatprep.subr.bf16.mxu0 %v767_v14  ;;  %773 = vmatpush1.bf16.msra.mxu1 %v765_v12  ;;  %v401_v12 = vld [vmem:[%s1283_s2] sm:$0xff]  ;;  %p893_p12 = pneg %p892_p10  ;;  %p898_p3 = scmp.lt.s32.totalorder %s896_s8, %s890_s22 }
  0x41   : > { %304 = vadd.xlane.f32.xlu0 %v303_v13  ;;  %772 = vmatprep.subr.bf16.mxu1 %v767_v14 }
  0x42   : > { %310 = vadd.xlane.f32.xlu1 %v309_v15  ;;  %v344_v15 = vld [vmem:[%s1286_s5 + $0x18] sm:$0xff]  ;;  %p899_p4 = por %p898_p3, %p897_p2 }
  0x43   : > { %770 = vmatpush1.bf16.msra.mxu0 %v769_v16 }
  0x44   : > { %774 = vmatpush1.bf16.msra.mxu1 %v769_v16  ;;  %p900_p7 = pnand %p899_p4, %p893_p12 }
  0x46   : > { %750 = vmatmul.mubr.msk.f32.vlgmr.msra.gmra.mrb[0].mxu0 %vm426_vm0, %v397_v17 }
  0x47   : > { %509 = vmatprep.mubr.f32.mxu0 %v961_v0  ;;  %752 = vmatmul.mubr.msk.f32.vlgmr.msra.gmra.mrb[0].mxu1 %vm426_vm0, %v399_v19 }
  0x48   : > { %521 = vmatprep.mubr.f32.mxu1 %v961_v0 }
  0x4a   : > { %751 = vmatmul.mubr.msk.f32.gmra.mrb[2].mxu0 %vm426_vm0, %v398_v18 }
  0x4b   : > { %753 = vmatmul.mubr.msk.f32.gmra.mrb[2].mxu1 %vm426_vm0, %v400_v20  ;;  %v403_v20 = vld [vmem:[%s1283_s2 + $0x10] sm:$0xff] }
  0xca   : > { %v302_v22 = vpop.xlane.xlu0 %301 }
  0xcb   : > { %v312_v23 = vmul.f32 0.00390625, %v302_v22  ;;  %v308_v24 = vpop.xlane.xlu1 %307 }
  0xcc   : > { %v314_v26 = vmul.f32 0.00390625, %v308_v24 }
  0xcd   : > { %v320_v30 = vmul.f32 %v316_v25, %v312_v23  ;;  %v404_v23 = vld [vmem:[%s1283_s2 + $0x18] sm:$0xff] }
  0xce   : > { %v305_v29 = vpop.xlane.xlu0 %304  ;;  %v322_v35 = vmul.f32 %v318_v27, %v314_v26  ;;  %v963_v27 = vmov 1  }
  0xcf   : > { %v313_v31 = vmul.f32 0.00390625, %v305_v29  ;;  %v311_v33 = vpop.xlane.xlu1 %310  ;;  %v325_v38 = vsel %vm324_vm1, %v320_v30, 0.0  ;;  %v964_v29 = vmov 2   ;;  %v366_v30 = vld [vmem:[%s1287_s6 + $0x8] sm:$0xff] }
  0xd0   : > { %v315_v34 = vmul.f32 0.00390625, %v311_v33  ;;  %v328_v41 = vsel %vm324_vm1, %v322_v35, 0.0 }
  0xd1   : > { %v321_v36 = vmul.f32 %v317_v28, %v313_v31  ;;  %v405_v28 = vld [vmem:[%s1283_s2] sm:$0x1] }
  0xd2   : > { %v323_v37 = vmul.f32 %v319_v32, %v315_v34  ;;  %v365_v31 = vld [vmem:[%s1287_s6] sm:$0xff] }
  0xd3   : > { %v326_v39 = vsel %vm324_vm1, %v321_v36, 0.0  ;;  %v367_v36 = vld [vmem:[%s1287_s6 + $0x10] sm:$0xff] }
  0xd4   : > { %v327_v40 = vadd.f32 %v326_v39, %v325_v38  ;;  %v330_v42 = vsel %vm324_vm1, %v323_v37, 0.0 }
  0xd6   : > { %v329_v43 = vadd.f32 %v328_v41, %v327_v40 }
  0xd8   : > { %v331_v44 = vadd.f32 %v330_v42, %v329_v43 }
  0xda   : > { %v332_v45 = vrot.slane %v331_v44, 4 }
  0xdc   : > { %v333_v46 = vadd.f32 %v332_v45, %v331_v44 }
  0xde   : > { %v334_v47 = vrot.slane %v333_v46, 2 }
  0xe0   : > { %v335_v49 = vadd.f32 %v334_v47, %v333_v46 }
  0xe2   : > { %v336_v50 = vrot.slane %v335_v49, 1 }
  0xe4   : > { %v337_v53 = vadd.f32 %v336_v50, %v335_v49 }
  0xe6   : > { %v339_v54 = vadd.f32 %v338_v52, %v337_v53 }
  0xe8   : > { %v340_v56 = vmax.f32 %v339_v54, 0.0 }
  0xea   : > { %v348_v59 = vrot.slane %v340_v56, %v1149_v55 }
  0xec   : > { %v350_v61 = vmul.f32 %v348_v59, %v342_v57  ;;  %v349_v62 = vmul.f32 %v348_v59, %v341_v58  ;;  %v351_v4 = vmul.f32 %v348_v59, %v343_v60  ;;  %v352_v18 = vmul.f32 %v348_v59, %v344_v15 }
  0xee   : > { %v356_v63 = vsel %vm324_vm1, %v350_v61, 0.0  ;;  %v353_v0 = vsel %vm324_vm1, %v349_v62, 0.0  ;;  %v359_v8 = vsel %vm324_vm1, %v351_v4, 0.0  ;;  %v362_v19 = vsel %vm324_vm1, %v352_v18, 0.0 }
  0xef   : > { %357 = vadd.xlane.f32.xlu1 %v356_v63  ;;  %354 = vadd.xlane.f32.xlu0 %v353_v0 }
  0xf3   : > { %360 = vadd.xlane.f32.xlu0 %v359_v8 }
 0x100   : > { %413 = vperm.xlu1 %834, %v402_v11  }
 0x109   : > { %408 = vperm.xlu0 %833, %v401_v12  }
 0x119   : > { %v1170_v13 = vpop.f32.mrb[0].mxu0 }
 0x11a   : > { %v1172_v14 = vpop.f32.mrb[1].mxu0  ;;  %v1185_v22 = vpop.f32.mrb[0].mxu1 }
 0x11b   : > { %v519_v24 = vpop.f32.mrb[1].mxu1 }
 0x11d   : > { %v1177_v16 = vpop.f32.mrb[2].mxu0 }
 0x11e   : > { %v1179_v17 = vpop.f32.mrb[3].mxu0  ;;  %v1190_v25 = vpop.f32.mrb[2].mxu1 }
 0x11f   : > { %v1192_v26 = vpop.f32.mrb[3].mxu1 }
 0x124   : > { %363 = vadd.xlane.f32.xlu1 %v362_v19 }
 0x135   : > { %418 = vperm.xlu1 %834, %v403_v20  }
 0x139   : > { %423 = vperm.xlu1 %834, %v404_v23  }
 0x13d   : > { %835 = vset.pattern.permute.xlu1 %v963_v27 }
 0x13e   : > { %537 = vperm.xlu1 %835, %v401_v12  }
 0x142   : > { %541 = vperm.xlu1 %835, %v402_v11  }
 0x146   : > { %545 = vperm.xlu1 %835, %v403_v20  }
 0x14a   : > { %549 = vperm.xlu1 %835, %v404_v23  }
 0x14e   : > { %836 = vset.pattern.permute.xlu1 %v964_v29 }
 0x14f   : > { %580 = vperm.xlu1 %836, %v405_v28  }
 0x153   : > { %837 = vset.pattern.permute.xlu1 %v962_v21 }
 0x17c   : > { %v358_v32 = vpop.xlane.xlu1 %357  ;;  %v355_v33 = vpop.xlane.xlu0 %354 }
 0x17d   : > { %v370_v34 = vadd.f32 %v366_v30, %v358_v32  ;;  %v369_v35 = vadd.f32 %v365_v31, %v355_v33 }
 0x17f   : > { %v747_v37 = vmul.f32 -1.442695, %v370_v34  ;;  %v746_v38 = vmul.f32 -1.442695, %v369_v35 }
 0x180   : > { %v361_v39 = vpop.xlane.xlu0 %360  ;;  %v414_v50 = vpop.permute.xlu1 %413 }
 0x181   : > { %838 = vpow2.f32 %v747_v37  ;;  %v371_v21 = vadd.f32 %v367_v36, %v361_v39  ;;  %v512_v61 = vadd.f32 %v1177_v16, %v414_v50  ;;  %v514_v62 = vadd.f32 %v1179_v17, %v414_v50 }
 0x182   : > { %840 = vpow2.f32 %v746_v38 }
 0x183   : > { %v748_v40 = vmul.f32 -1.442695, %v371_v21  ;;  %v530_v15 = vmax.f32 %v512_v61, 0.0  ;;  %v531_v18 = vmax.f32 %v514_v62, 0.0 }
 0x185   : > { %842 = vpow2.f32 %v748_v40 }
 0x188   : > { %v409_v57 = vpop.permute.xlu0 %408 }
 0x189   : > { %v506_v58 = vadd.f32 %v1170_v13, %v409_v57  ;;  %v508_v59 = vadd.f32 %v1172_v14, %v409_v57 }
 0x18b   : > { %v839_v41 = vpop.eup %838  ;;  %v528_v63 = vmax.f32 %v506_v58, 0.0  ;;  %v529_v0 = vmax.f32 %v508_v59, 0.0 }
 0x18c   : > { %v841_v42 = vpop.eup %840  ;;  %v386_v43 = vadd.f32 1.0, %v839_v41 }
 0x18d   : > { %v385_v44 = vadd.f32 1.0, %v841_v42 }
 0x18e   : > { %844 = vrcp.f32 %v386_v43 }
 0x18f   : > { %v843_v45 = vpop.eup %842  ;;  %846 = vrcp.f32 %v385_v44 }
 0x190   : > { %v387_v46 = vadd.f32 1.0, %v843_v45 }
 0x192   : > { %848 = vrcp.f32 %v387_v46 }
 0x198   : > { %v845_v47 = vpop.eup %844 }
 0x199   : > { %v847_v48 = vpop.eup %846  ;;  %604 = vperm.xlu1 %837, %v845_v47  }
 0x19a   : > { %599 = vperm.xlu0 %833, %v847_v48  }
 0x19c   : > { %v849_v49 = vpop.eup %848 }
 0x19e   : > { %609 = vperm.xlu0 %833, %v849_v49  }
 0x1b1   : > { %v364_v52 = vpop.xlane.xlu1 %363 }
 0x1b2   : > { %v372_v53 = vadd.f32 %v368_v51, %v364_v52 }
 0x1b4   : > { %v749_v54 = vmul.f32 -1.442695, %v372_v53 }
 0x1b5   : > { %v419_v56 = vpop.permute.xlu1 %418 }
 0x1b6   : > { %850 = vpow2.f32 %v749_v54  ;;  %v518_v8 = vadd.f32 %v1185_v22, %v419_v56  ;;  %v520_v11 = vadd.f32 %v519_v24, %v419_v56 }
 0x1b8   : > { %v532_v28 = vmax.f32 %v518_v8, 0.0  ;;  %v533_v16 = vmax.f32 %v520_v11, 0.0 }
 0x1b9   : > { %v424_v60 = vpop.permute.xlu1 %423 }
 0x1ba   : > { %v524_v17 = vadd.f32 %v1190_v25, %v424_v60  ;;  %v526_v29 = vadd.f32 %v1192_v26, %v424_v60 }
 0x1bc   : > { %v534_v33 = vmax.f32 %v524_v17, 0.0  ;;  %v535_v34 = vmax.f32 %v526_v29, 0.0 }
 0x1bd   : > { %v538_v4 = vpop.permute.xlu1 %537 }
 0x1be   : > { %v552_v19 = vmul.f32 %v538_v4, %v528_v63  ;;  %v553_v20 = vmul.f32 %v538_v4, %v529_v0 }
 0x1c0   : > { %v851_v12 = vpop.eup %850 }
 0x1c1   : > { %v388_v23 = vadd.f32 1.0, %v851_v12  ;;  %v542_v13 = vpop.permute.xlu1 %541 }
 0x1c2   : > { %v554_v27 = vmul.f32 %v542_v13, %v530_v15  ;;  %v555_v14 = vmul.f32 %v542_v13, %v531_v18 }
 0x1c3   : > { %852 = vrcp.f32 %v388_v23 }
 0x1c4   : > { %v560_v30 = vadd.f32 %v554_v27, %v552_v19  ;;  %v569_v31 = vadd.f32 %v555_v14, %v553_v20 }
 0x1c5   : > { %v546_v22 = vpop.permute.xlu1 %545 }
 0x1c6   : > { %v556_v24 = vmul.f32 %v546_v22, %v532_v28  ;;  %v557_v32 = vmul.f32 %v546_v22, %v533_v16 }
 0x1c8   : > { %v561_v35 = vadd.f32 %v560_v30, %v556_v24  ;;  %v570_v36 = vadd.f32 %v569_v31, %v557_v32 }
 0x1c9   : > { %v550_v37 = vpop.permute.xlu1 %549 }
 0x1ca   : > { %v558_v38 = vmul.f32 %v550_v37, %v534_v33  ;;  %v559_v39 = vmul.f32 %v550_v37, %v535_v34 }
 0x1cc   : > { %v562_v21 = vadd.f32 %v561_v35, %v558_v38  ;;  %v571_v40 = vadd.f32 %v570_v36, %v559_v39 }
 0x1cd   : > { %v853_v41 = vpop.eup %852 }
 0x1ce   : > { %614 = vperm.xlu1 %837, %v853_v41   ;;  %v563_v42 = vrot.slane %v562_v21, 4  ;;  %v572_v25 = vrot.slane %v571_v40, 4  ;;  %v581_v51 = vpop.permute.xlu1 %580 }
 0x1d0   : > { %v564_v43 = vadd.f32 %v563_v42, %v562_v21  ;;  %v573_v26 = vadd.f32 %v572_v25, %v571_v40 }
 0x1d2   : > { %v565_v44 = vrot.slane %v564_v43, 2  ;;  %v574_v45 = vrot.slane %v573_v26, 2 }
 0x1d4   : > { %v566_v46 = vadd.f32 %v565_v44, %v564_v43  ;;  %v575_v47 = vadd.f32 %v574_v45, %v573_v26 }
 0x1d6   : > { %v567_v48 = vrot.slane %v566_v46, 1  ;;  %v576_v49 = vrot.slane %v575_v47, 1 }
 0x1d8   : > { %v568_v50 = vadd.f32 %v567_v48, %v566_v46  ;;  %v577_v52 = vadd.f32 %v576_v49, %v575_v47 }
 0x1da   : > { %v583_v53 = vadd.f32 %v581_v51, %v568_v50  ;;  %v584_v54 = vadd.f32 %v581_v51, %v577_v52 }
 0x1dc   : > { %v754_v56 = vmul.f32 -1.442695, %v583_v53  ;;  %v755_v57 = vmul.f32 -1.442695, %v584_v54 }
 0x1de   : > { %854 = vpow2.f32 %v754_v56 }
 0x1df   : > { %856 = vpow2.f32 %v755_v57 }
 0x1e8   : > { %v855_v58 = vpop.eup %854 }
 0x1e9   : > { %v857_v59 = vpop.eup %856  ;;  %v591_v60 = vadd.f32 1.0, %v855_v58 }
 0x1ea   : > { %v592_v61 = vadd.f32 1.0, %v857_v59 }
 0x1eb   : > { %858 = vrcp.f32 %v591_v60 }
 0x1ec   : > { %860 = vrcp.f32 %v592_v61 }
 0x1f5   : > { %v859_v62 = vpop.eup %858 }
 0x1f6   : > { %v861_v63 = vpop.eup %860  ;;  %v628_v11 = vrot.slane %v859_v62, %v1149_v55 }
 0x1f7   : > { %v632_v12 = vrot.slane %v861_v63, %v1149_v55 }
 0x218   : > { %v605_v0 = vpop.permute.xlu1 %604 }
 0x219   : > { %v619_v4 = vmul.f32 %v605_v0, %v1106_v6  ;;  %v620_v8 = vmul.f32 %v605_v0, %v1108_v7  ;;  %v600_v15 = vpop.permute.xlu0 %599 }
 0x21a   : > { %v617_v18 = vmul.f32 %v600_v15, %v1096_v1  ;;  %v618_v19 = vmul.f32 %v600_v15, %v1098_v2 }
 0x21b   : > { %v635_v20 = vmul.f32 %v628_v11, %v619_v4  ;;  %v636_v23 = vmul.f32 %v632_v12, %v620_v8 }
 0x21c   : > { %v633_v13 = vmul.f32 %v628_v11, %v617_v18  ;;  %v634_v27 = vmul.f32 %v632_v12, %v618_v19 }
 0x21d   : > { %643 = vst [vmem:[%s286_s18 + $0x10] sm:$0xff] %v635_v20  ;;  %644 = vst [vmem:[%s286_s18 + $0x18] sm:$0xff] %v636_v23  ;;  %v610_v6 = vpop.permute.xlu0 %609 }
 0x21e   : > { %641 = vst [vmem:[%s286_s18] sm:$0xff] %v633_v13  ;;  %642 = vst [vmem:[%s286_s18 + $0x8] sm:$0xff] %v634_v27  ;;  %v621_v7 = vmul.f32 %v610_v6, %v1100_v3  ;;  %v622_v55 = vmul.f32 %v610_v6, %v1104_v5 }
 0x220   : > { %v637_v14 = vmul.f32 %v628_v11, %v621_v7  ;;  %v638_v1 = vmul.f32 %v632_v12, %v622_v55 }
 0x222   : > { %645 = vst [vmem:[%s286_s18 + $0x20] sm:$0xff] %v637_v14  ;;  %646 = vst [vmem:[%s286_s18 + $0x28] sm:$0xff] %v638_v1 }
 0x24d   : > { %v615_v2 = vpop.permute.xlu1 %614 }
 0x24e   : > { %v623_v28 = vmul.f32 %v615_v2, %v1112_v9  ;;  %v624_v16 = vmul.f32 %v615_v2, %v1114_v10 }
 0x250   : > { %v639_v3 = vmul.f32 %v628_v11, %v623_v28  ;;  %v640_v5 = vmul.f32 %v632_v12, %v624_v16 }
 0x252   : > { %647 = vst [vmem:[%s286_s18 + $0x30] sm:$0xff] %v639_v3  ;;  %648 = vst [vmem:[%s286_s18 + $0x38] sm:$0xff] %v640_v5 }
 0x253   : > { %903 = shalt.err (!%p900_p7)
}
 0x254   : > { %s904_s9 = scalar_lea.hbm %s1234_s21, 1024  ;;  %s908_s16 = scalar_lea.hbm %s1288_s7, 2048 }
 0x255   : > { %p905_p8 = scmp.ne.s32.totalorder %s1234_s21, %s904_s9  ;;  %p909_p1 = scmp.lt.u32.totalorder %s1234_s21, %s1288_s7 }
 0x256   : > { %p910_p0 = scmp.lt.u32.totalorder %s908_s16, %s904_s9  ;;  %p912_p6 = scmp.lt.u32.totalorder %s904_s9, %s1234_s21 }
 0x257   : > { %p906_p11 = pnand %p905_p8, %p1299_p9 }
 0x258   : > { %p911_p5 = por %p910_p0, %p909_p1 }
 0x259   : > { %p907_p13 = pneg %p906_p11 }
 0x25a   : > { %p913_p10 = por %p912_p6, %p911_p5 }
 0x25c   : > { %p914_p12 = pnand %p913_p10, %p907_p13 }
 0x25e   : > { %917 = shalt.err (!%p914_p12)
}
 0x25f   : > { %s966_s15 = smov 256   ;;  %s967_s13 = smov 16  }
 0x260   : > { %779 = dma.vmem_to_hbm [thread:$0]  (%p1299_p9), %s1236_s20, 1024, %s1234_s21, %s1240_s28, %s966_s15, %s966_s15, %s967_s13  }
 0x261 PF: > { %p791_p2 = scmp.ge.s32.totalorder %s956_s27, 2  ;;  %s678_s22 = sand.u32 1, %s944_s24  }
 0x262   : > { %p1300_p3 = scmp.ne.s32.totalorder %s1293_s12, 0  ;;  %s679_s23 = scalar_lea.sflag [#allocation4], %s678_s22 }
 0x264   : > { %p786_p4 = pnand %p791_p2, %p1300_p3 }
 0x266   : > { %939 = dma.done.wait (!%p786_p4), %s679_s23, 1024  }
 0x267   : > { %941 = vsyncadd (!%p786_p4), %s679_s23, 4294966272  ;;  %p18_p7 = scmp.ge.s32.totalorder %s1033_s30, 4   ;;  %s1301_s24 = smov %s948_s25 }
 0x268   : > { %s1302_s25 = smov %s952_s26  ;;  %s1303_s26 = smov %s1044_s10 }
 0x269   : > { %s1304_s27 = smov %s1033_s30  ;;  %20 = sbr.rel (!%p18_p7) target bundleno = 4 (0x4), region = 88 }
 0x270   :  { %684 = vsyncpa [#allocation3], 1 }
 0x271   :  { %686 = vsyncpa [#allocation3 + $0x1], 1 }
 0x272   :  { %687 = vsyncpa [#allocation4], 1 }
 0x273   :  { %689 = vsyncpa [#allocation4 + $0x1], 1 }

</bundles_post_ra>
